<compile_context>
chip_gen: v5e
topology: v5e:2x2
jax: 0.10.0
libtpu: 0.0.40
codegen_flags: <defaults>
</compile_context>

<pallas_src>
import functools

import jax
import jax.numpy as jnp
from jax import lax
from jax.experimental import pallas as pl
from jax.experimental.pallas import tpu as pltpu

BN_EPS = 1e-5
LANE = 128


def _bn_relu(z, gamma, beta, inv_batch):
    # Single-pass batch statistics (sum & sum-of-squares), biased variance,
    # matching PyTorch BatchNorm1d training semantics.  All in f32.
    # (Zero pad rows contribute nothing to s1/s2; inv_batch = 1/true_batch.)
    s1 = jnp.sum(z, axis=0, keepdims=True)
    s2 = jnp.sum(z * z, axis=0, keepdims=True)
    mean = s1 * inv_batch
    var = s2 * inv_batch - mean * mean
    zn = (z - mean) * lax.rsqrt(var + BN_EPS)
    return jnp.maximum(zn * gamma + beta, 0.0)


def vicreg_fused_kernel(x_ref, wbT_ref, w_ref, vec_ref, out_ref, *,
                        batch, c_in, num_ftrs, hidden, out_pad, pad_b):
    # x_ref   : (B*C, S)          -- S = H*W on the lane axis (no wrapper transpose)
    # wbT_ref : (F, C+1)          -- 1x1-conv weight transposed, bias in last column
    # w_ref   : (F+2H, L)         -- rows [0:F)=w1, [F:F+H)=w2, [F+H:F+2H)=w3 (col-padded)
    # vec_ref : (5, L)            -- rows: g1, be1, g2, be2, b3 (col-padded)
    # out_ref : (PB, out_pad)     -- lane-dense output slab; wrapper slices [:B, :O]
    F, Hd = num_ftrs, hidden
    s = x_ref.shape[1]
    inv_s = 1.0 / s
    inv_b = 1.0 / batch

    # ---- backbone (1x1 conv + ReLU) + adaptive avg pool, held in vregs -----
    # Per batch: (F, S) activation built from C broadcast FMAs on the VPU,
    # then a lane reduction over S.  B, C are tiny & static -> Python unroll.
    cols = []
    for b in range(batch):
        acc = wbT_ref[:, c_in:c_in + 1]                  # (F, 1) conv bias column
        for c in range(c_in):
            acc = acc + wbT_ref[:, c:c + 1] * x_ref[b * c_in + c: b * c_in + c + 1, :]
        h = jnp.maximum(acc, 0.0)                        # (F, S) ReLU
        cols.append(jnp.sum(h, axis=1, keepdims=True) * inv_s)   # (F, 1)
    if pad_b > batch:
        cols.append(jnp.zeros((F, pad_b - batch), jnp.float32))  # zero pad columns
    pooled = jnp.concatenate(cols, axis=1)               # (F, PB), no VMEM scratch

    # ---- projection head (BarlowTwinsProjectionHead) ------------------------
    # Static slices of the packed slabs are zero-cost Ref views.
    w1 = w_ref[0:F, 0:Hd]
    w2 = w_ref[F:F + Hd, 0:Hd]
    w3 = w_ref[F + Hd:F + 2 * Hd, 0:out_pad]
    g1, be1 = vec_ref[0:1, 0:Hd], vec_ref[1:2, 0:Hd]
    g2, be2 = vec_ref[2:3, 0:Hd], vec_ref[3:4, 0:Hd]
    b3 = vec_ref[4:5, 0:out_pad]

    # (F, PB) x (F, H) contracting dim 0 of both operands: the (F,B)->(B,F)
    # flip is folded into the first MXU matmul.
    z = lax.dot_general(pooled, w1, (((0,), (0,)), ((), ())),
                        preferred_element_type=jnp.float32)       # (PB, H)
    z = _bn_relu(z, g1, be1, inv_b)
    # Pad rows were exactly zero going into the first BN, but are nonzero after
    # it; re-zero them so the second BN's statistics stay correct.
    row_ok = lax.broadcasted_iota(jnp.int32, z.shape, 0) < batch
    z = jnp.where(row_ok, z, 0.0)

    z = jnp.dot(z, w2, preferred_element_type=jnp.float32)         # (PB, H)
    z = _bn_relu(z, g2, be2, inv_b)
    # No masking needed here: nothing downstream computes batch statistics,
    # and the wrapper slices the pad rows off the output.

    z = jnp.dot(z, w3, preferred_element_type=jnp.float32) + b3    # (PB, out_pad)
    out_ref[...] = z


def vicreg_forward(x_nchw, params):
    B, C, Hsp, Wsp = x_nchw.shape
    S = Hsp * Wsp
    F = params["wbT"].shape[0]
    hidden = params["w1"].shape[1]
    out_dim = params["w3"].shape[1]

    out_pad = ((out_dim + LANE - 1) // LANE) * LANE      # lane-dense output slab
    L = max(hidden, out_pad)
    pad_b = max(B, 8)                                    # full 8-sublane tile

    # NCHW -> (B*C, S): a pure (free) reshape, no transpose; S stays lane-dense.
    x2d = x_nchw.reshape(B * C, S).astype(jnp.float32)

    # ---- wrapper-side packing: 11 tiny inputs -> 4 DMAs --------------------
    # Backbone weight with its bias folded in as an extra column: (F, C+1).
    wbT_aug = jnp.concatenate([params["wbT"], params["bb"]], axis=1)

    def pad_cols(w):
        return jnp.pad(w, ((0, 0), (0, L - w.shape[1])))

    # One packed weight slab (row-wise) and one packed vector slab.
    w_pack = jnp.concatenate(
        [pad_cols(params["w1"]), pad_cols(params["w2"]), pad_cols(params["w3"])],
        axis=0)                                          # (F + 2H, L)
    vec_pack = jnp.concatenate(
        [pad_cols(params["g1"]), pad_cols(params["be1"]),
         pad_cols(params["g2"]), pad_cols(params["be2"]),
         pad_cols(params["b3"])],
        axis=0)                                          # (5, L)

    kernel = functools.partial(
        vicreg_fused_kernel, batch=B, c_in=C, num_ftrs=F,
        hidden=hidden, out_pad=out_pad, pad_b=pad_b)
    vmem = pl.BlockSpec(memory_space=pltpu.MemorySpace.VMEM)

    out = pl.pallas_call(
        kernel,
        out_shape=jax.ShapeDtypeStruct((pad_b, out_pad), jnp.float32),
        in_specs=[vmem] * 4,
        out_specs=vmem,
    )(x2d, wbT_aug, w_pack, vec_pack)
    return out[:B, :out_dim]


# ---------------- Pure-JAX reference (for self-check) ----------------
def vicreg_reference(x_nchw, params):
    B, C, H, W = x_nchw.shape
    x = x_nchw.reshape(B, C, H * W).astype(jnp.float32)
    wb = params["wbT"].T                                          # (C, F)
    h = jnp.maximum(jnp.einsum("bcs,cf->bsf", x, wb) + params["bb"].T, 0.0)
    h = jnp.mean(h, axis=1)                                       # (B, F)

    def bn_relu(z, g, b):
        m = jnp.mean(z, axis=0, keepdims=True)
        v = jnp.mean((z - m) ** 2, axis=0, keepdims=True)
        return jnp.maximum((z - m) * lax.rsqrt(v + BN_EPS) * g + b, 0.0)

    z = bn_relu(h @ params["w1"], params["g1"], params["be1"])
    z = bn_relu(z @ params["w2"], params["g2"], params["be2"])
    return z @ params["w3"] + params["b3"]


def init_params(key, c_in, num_ftrs, hidden_dim, out_dim):
    ks = jax.random.split(key, 5)

    def lin(k, fan_in, fan_out):
        bound = 1.0 / jnp.sqrt(fan_in)
        return jax.random.uniform(k, (fan_in, fan_out), jnp.float32, -bound, bound)

    return {
        # synthetic backbone: Conv2d(c_in, num_ftrs, kernel_size=1), stored transposed (F, C)
        "wbT": lin(ks[0], c_in, num_ftrs).T,
        "bb": jnp.zeros((num_ftrs, 1), jnp.float32),
        # projection head
        "w1": lin(ks[1], num_ftrs, hidden_dim),
        "g1": jnp.ones((1, hidden_dim), jnp.float32),
        "be1": jnp.zeros((1, hidden_dim), jnp.float32),
        "w2": lin(ks[2], hidden_dim, hidden_dim),
        "g2": jnp.ones((1, hidden_dim), jnp.float32),
        "be2": jnp.zeros((1, hidden_dim), jnp.float32),
        "w3": lin(ks[3], hidden_dim, out_dim),
        "b3": (1.0 / jnp.sqrt(hidden_dim)) *
              (2.0 * jax.random.uniform(ks[4], (1, out_dim), jnp.float32) - 1.0),
    }


if __name__ == "__main__":
    # Small shapes consistent with the module's forward:
    # batch=2, channels=4, spatial=16x16, num_ftrs=32, hidden=128, out_dim=64
    B, C, H, W = 2, 4, 16, 16
    NUM_FTRS, HIDDEN, OUT_DIM = 32, 128, 64

    key = jax.random.PRNGKey(0)
    kx, kp = jax.random.split(key)
    x = jax.random.normal(kx, (B, C, H, W), jnp.float32)
    params = init_params(kp, C, NUM_FTRS, HIDDEN, OUT_DIM)

    out = jax.block_until_ready(vicreg_forward(x, params))
    ref = vicreg_reference(x, params)

    assert out.shape == (B, OUT_DIM)
    assert jnp.allclose(out, ref, atol=2e-4, rtol=2e-4), "mismatch vs reference"

    # TODO(synk): backbone is synthetic (1x1 conv + ReLU); VICReg accepts an
    # arbitrary torch backbone which cannot be translated generically.
    print("KERNEL_OK")
</pallas_src>

<mosaic_0001>
module attributes {stable_mosaic.version = 11 : i64} {
  func.func @vicreg_fused_kernel(%arg0: memref<8x256xf32, #tpu.memory_space<vmem>>, %arg1: memref<32x5xf32, #tpu.memory_space<vmem>>, %arg2: memref<288x128xf32, #tpu.memory_space<vmem>>, %arg3: memref<5x128xf32, #tpu.memory_space<vmem>>, %arg4: memref<8x128xf32, #tpu.memory_space<vmem>>) attributes {dimension_semantics = [], scalar_prefetch = 0 : i64, scratch_operands = 0 : i64, tpu.core_type = #tpu.core_type<tc>} {
    %c0 = arith.constant 0 : index
    %c4 = arith.constant 4 : index
    %0 = vector.load %arg1[%c0, %c4] : memref<32x5xf32, #tpu.memory_space<vmem>>, vector<32x1xf32>
    %c0_0 = arith.constant 0 : index
    %c0_1 = arith.constant 0 : index
    %1 = vector.load %arg1[%c0_0, %c0_1] : memref<32x5xf32, #tpu.memory_space<vmem>>, vector<32x1xf32>
    %c0_2 = arith.constant 0 : index
    %c0_3 = arith.constant 0 : index
    %2 = vector.load %arg0[%c0_2, %c0_3] : memref<8x256xf32, #tpu.memory_space<vmem>>, vector<1x256xf32>
    %3 = vector.broadcast %1 : vector<32x1xf32> to vector<32x256xf32>
    %4 = vector.broadcast %2 : vector<1x256xf32> to vector<32x256xf32>
    %5 = arith.mulf %3, %4 : vector<32x256xf32>
    %6 = vector.broadcast %0 : vector<32x1xf32> to vector<32x256xf32>
    %7 = arith.addf %6, %5 : vector<32x256xf32>
    %c0_4 = arith.constant 0 : index
    %c1 = arith.constant 1 : index
    %8 = vector.load %arg1[%c0_4, %c1] : memref<32x5xf32, #tpu.memory_space<vmem>>, vector<32x1xf32>
    %c1_5 = arith.constant 1 : index
    %c0_6 = arith.constant 0 : index
    %9 = vector.load %arg0[%c1_5, %c0_6] : memref<8x256xf32, #tpu.memory_space<vmem>>, vector<1x256xf32>
    %10 = vector.broadcast %8 : vector<32x1xf32> to vector<32x256xf32>
    %11 = vector.broadcast %9 : vector<1x256xf32> to vector<32x256xf32>
    %12 = arith.mulf %10, %11 : vector<32x256xf32>
    %13 = arith.addf %7, %12 : vector<32x256xf32>
    %c0_7 = arith.constant 0 : index
    %c2 = arith.constant 2 : index
    %14 = vector.load %arg1[%c0_7, %c2] : memref<32x5xf32, #tpu.memory_space<vmem>>, vector<32x1xf32>
    %c2_8 = arith.constant 2 : index
    %c0_9 = arith.constant 0 : index
    %15 = vector.load %arg0[%c2_8, %c0_9] : memref<8x256xf32, #tpu.memory_space<vmem>>, vector<1x256xf32>
    %16 = vector.broadcast %14 : vector<32x1xf32> to vector<32x256xf32>
    %17 = vector.broadcast %15 : vector<1x256xf32> to vector<32x256xf32>
    %18 = arith.mulf %16, %17 : vector<32x256xf32>
    %19 = arith.addf %13, %18 : vector<32x256xf32>
    %c0_10 = arith.constant 0 : index
    %c3 = arith.constant 3 : index
    %20 = vector.load %arg1[%c0_10, %c3] : memref<32x5xf32, #tpu.memory_space<vmem>>, vector<32x1xf32>
    %c3_11 = arith.constant 3 : index
    %c0_12 = arith.constant 0 : index
    %21 = vector.load %arg0[%c3_11, %c0_12] : memref<8x256xf32, #tpu.memory_space<vmem>>, vector<1x256xf32>
    %22 = vector.broadcast %20 : vector<32x1xf32> to vector<32x256xf32>
    %23 = vector.broadcast %21 : vector<1x256xf32> to vector<32x256xf32>
    %24 = arith.mulf %22, %23 : vector<32x256xf32>
    %25 = arith.addf %19, %24 : vector<32x256xf32>
    %cst = arith.constant 0.000000e+00 : f32
    %26 = vector.broadcast %cst : f32 to vector<32x256xf32>
    %27 = arith.maximumf %25, %26 : vector<32x256xf32>
    %cst_13 = arith.constant dense<0.000000e+00> : vector<32xf32>
    %28 = vector.multi_reduction <add>, %27, %cst_13 [1] : vector<32x256xf32> to vector<32xf32>
    %29 = vector.shape_cast %28 : vector<32xf32> to vector<32x1xf32>
    %cst_14 = arith.constant 3.906250e-03 : f32
    %30 = vector.broadcast %cst_14 : f32 to vector<32x1xf32>
    %31 = arith.mulf %29, %30 : vector<32x1xf32>
    %c0_15 = arith.constant 0 : index
    %c4_16 = arith.constant 4 : index
    %32 = vector.load %arg1[%c0_15, %c4_16] : memref<32x5xf32, #tpu.memory_space<vmem>>, vector<32x1xf32>
    %c0_17 = arith.constant 0 : index
    %c0_18 = arith.constant 0 : index
    %33 = vector.load %arg1[%c0_17, %c0_18] : memref<32x5xf32, #tpu.memory_space<vmem>>, vector<32x1xf32>
    %c4_19 = arith.constant 4 : index
    %c0_20 = arith.constant 0 : index
    %34 = vector.load %arg0[%c4_19, %c0_20] : memref<8x256xf32, #tpu.memory_space<vmem>>, vector<1x256xf32>
    %35 = vector.broadcast %33 : vector<32x1xf32> to vector<32x256xf32>
    %36 = vector.broadcast %34 : vector<1x256xf32> to vector<32x256xf32>
    %37 = arith.mulf %35, %36 : vector<32x256xf32>
    %38 = vector.broadcast %32 : vector<32x1xf32> to vector<32x256xf32>
    %39 = arith.addf %38, %37 : vector<32x256xf32>
    %c0_21 = arith.constant 0 : index
    %c1_22 = arith.constant 1 : index
    %40 = vector.load %arg1[%c0_21, %c1_22] : memref<32x5xf32, #tpu.memory_space<vmem>>, vector<32x1xf32>
    %c5 = arith.constant 5 : index
    %c0_23 = arith.constant 0 : index
    %41 = vector.load %arg0[%c5, %c0_23] : memref<8x256xf32, #tpu.memory_space<vmem>>, vector<1x256xf32>
    %42 = vector.broadcast %40 : vector<32x1xf32> to vector<32x256xf32>
    %43 = vector.broadcast %41 : vector<1x256xf32> to vector<32x256xf32>
    %44 = arith.mulf %42, %43 : vector<32x256xf32>
    %45 = arith.addf %39, %44 : vector<32x256xf32>
    %c0_24 = arith.constant 0 : index
    %c2_25 = arith.constant 2 : index
    %46 = vector.load %arg1[%c0_24, %c2_25] : memref<32x5xf32, #tpu.memory_space<vmem>>, vector<32x1xf32>
    %c6 = arith.constant 6 : index
    %c0_26 = arith.constant 0 : index
    %47 = vector.load %arg0[%c6, %c0_26] : memref<8x256xf32, #tpu.memory_space<vmem>>, vector<1x256xf32>
    %48 = vector.broadcast %46 : vector<32x1xf32> to vector<32x256xf32>
    %49 = vector.broadcast %47 : vector<1x256xf32> to vector<32x256xf32>
    %50 = arith.mulf %48, %49 : vector<32x256xf32>
    %51 = arith.addf %45, %50 : vector<32x256xf32>
    %c0_27 = arith.constant 0 : index
    %c3_28 = arith.constant 3 : index
    %52 = vector.load %arg1[%c0_27, %c3_28] : memref<32x5xf32, #tpu.memory_space<vmem>>, vector<32x1xf32>
    %c7 = arith.constant 7 : index
    %c0_29 = arith.constant 0 : index
    %53 = vector.load %arg0[%c7, %c0_29] : memref<8x256xf32, #tpu.memory_space<vmem>>, vector<1x256xf32>
    %54 = vector.broadcast %52 : vector<32x1xf32> to vector<32x256xf32>
    %55 = vector.broadcast %53 : vector<1x256xf32> to vector<32x256xf32>
    %56 = arith.mulf %54, %55 : vector<32x256xf32>
    %57 = arith.addf %51, %56 : vector<32x256xf32>
    %cst_30 = arith.constant 0.000000e+00 : f32
    %58 = vector.broadcast %cst_30 : f32 to vector<32x256xf32>
    %59 = arith.maximumf %57, %58 : vector<32x256xf32>
    %cst_31 = arith.constant dense<0.000000e+00> : vector<32xf32>
    %60 = vector.multi_reduction <add>, %59, %cst_31 [1] : vector<32x256xf32> to vector<32xf32>
    %61 = vector.shape_cast %60 : vector<32xf32> to vector<32x1xf32>
    %cst_32 = arith.constant 3.906250e-03 : f32
    %62 = vector.broadcast %cst_32 : f32 to vector<32x1xf32>
    %63 = arith.mulf %61, %62 : vector<32x1xf32>
    %cst_33 = arith.constant 0.000000e+00 : f32
    %64 = vector.broadcast %cst_33 : f32 to vector<32x6xf32>
    %65 = tpu.concatenate %31, %63, %64 in 1 : vector<32x1xf32>, vector<32x1xf32>, vector<32x6xf32> -> vector<32x8xf32>
    %c0_34 = arith.constant 0 : index
    %c0_35 = arith.constant 0 : index
    %66 = vector.load %arg2[%c0_34, %c0_35] : memref<288x128xf32, #tpu.memory_space<vmem>>, vector<32x128xf32>
    %c32 = arith.constant 32 : index
    %c0_36 = arith.constant 0 : index
    %67 = vector.load %arg2[%c32, %c0_36] : memref<288x128xf32, #tpu.memory_space<vmem>>, vector<128x128xf32>
    %c160 = arith.constant 160 : index
    %c0_37 = arith.constant 0 : index
    %68 = vector.load %arg2[%c160, %c0_37] : memref<288x128xf32, #tpu.memory_space<vmem>>, vector<128x128xf32>
    %c0_38 = arith.constant 0 : index
    %c0_39 = arith.constant 0 : index
    %69 = vector.load %arg3[%c0_38, %c0_39] : memref<5x128xf32, #tpu.memory_space<vmem>>, vector<1x128xf32>
    %c1_40 = arith.constant 1 : index
    %c0_41 = arith.constant 0 : index
    %70 = vector.load %arg3[%c1_40, %c0_41] : memref<5x128xf32, #tpu.memory_space<vmem>>, vector<1x128xf32>
    %c2_42 = arith.constant 2 : index
    %c0_43 = arith.constant 0 : index
    %71 = vector.load %arg3[%c2_42, %c0_43] : memref<5x128xf32, #tpu.memory_space<vmem>>, vector<1x128xf32>
    %c3_44 = arith.constant 3 : index
    %c0_45 = arith.constant 0 : index
    %72 = vector.load %arg3[%c3_44, %c0_45] : memref<5x128xf32, #tpu.memory_space<vmem>>, vector<1x128xf32>
    %c4_46 = arith.constant 4 : index
    %c0_47 = arith.constant 0 : index
    %73 = vector.load %arg3[%c4_46, %c0_47] : memref<5x128xf32, #tpu.memory_space<vmem>>, vector<1x128xf32>
    %cst_48 = arith.constant dense<0.000000e+00> : vector<8x128xf32>
    %74 = tpu.matmul %65, %66, %cst_48 {dimension_numbers = #tpu.dot_dimension_numbers<[0], [0], [1], [1], [0, 1, 1, 1], [], []>} : vector<32x8xf32>, vector<32x128xf32>, vector<8x128xf32> -> vector<8x128xf32>
    %cst_49 = arith.constant dense<0.000000e+00> : vector<128xf32>
    %75 = vector.multi_reduction <add>, %74, %cst_49 [0] : vector<8x128xf32> to vector<128xf32>
    %76 = vector.shape_cast %75 : vector<128xf32> to vector<1x128xf32>
    %77 = arith.mulf %74, %74 : vector<8x128xf32>
    %cst_50 = arith.constant dense<0.000000e+00> : vector<128xf32>
    %78 = vector.multi_reduction <add>, %77, %cst_50 [0] : vector<8x128xf32> to vector<128xf32>
    %79 = vector.shape_cast %78 : vector<128xf32> to vector<1x128xf32>
    %cst_51 = arith.constant 5.000000e-01 : f32
    %80 = vector.broadcast %cst_51 : f32 to vector<1x128xf32>
    %81 = arith.mulf %76, %80 : vector<1x128xf32>
    %cst_52 = arith.constant 5.000000e-01 : f32
    %82 = vector.broadcast %cst_52 : f32 to vector<1x128xf32>
    %83 = arith.mulf %79, %82 : vector<1x128xf32>
    %84 = arith.mulf %81, %81 : vector<1x128xf32>
    %85 = arith.subf %83, %84 : vector<1x128xf32>
    %86 = vector.broadcast %81 : vector<1x128xf32> to vector<8x128xf32>
    %87 = arith.subf %74, %86 : vector<8x128xf32>
    %cst_53 = arith.constant 9.99999974E-6 : f32
    %88 = vector.broadcast %cst_53 : f32 to vector<1x128xf32>
    %89 = arith.addf %85, %88 : vector<1x128xf32>
    %90 = math.rsqrt %89 : vector<1x128xf32>
    %91 = vector.broadcast %90 : vector<1x128xf32> to vector<8x128xf32>
    %92 = arith.mulf %87, %91 : vector<8x128xf32>
    %93 = vector.broadcast %69 : vector<1x128xf32> to vector<8x128xf32>
    %94 = arith.mulf %92, %93 : vector<8x128xf32>
    %95 = vector.broadcast %70 : vector<1x128xf32> to vector<8x128xf32>
    %96 = arith.addf %94, %95 : vector<8x128xf32>
    %cst_54 = arith.constant 0.000000e+00 : f32
    %97 = vector.broadcast %cst_54 : f32 to vector<8x128xf32>
    %98 = arith.maximumf %96, %97 : vector<8x128xf32>
    %99 = tpu.iota {dimensions = array<i32: 0>} : vector<8x128xi32>
    %c2_i32 = arith.constant 2 : i32
    %100 = vector.broadcast %c2_i32 : i32 to vector<8x128xi32>
    %101 = arith.cmpi slt, %99, %100 : vector<8x128xi32>
    %cst_55 = arith.constant 0.000000e+00 : f32
    %102 = vector.broadcast %cst_55 : f32 to vector<8x128xf32>
    %103 = arith.select %101, %98, %102 : vector<8x128xi1>, vector<8x128xf32>
    %cst_56 = arith.constant dense<0.000000e+00> : vector<8x128xf32>
    %104 = tpu.matmul %103, %67, %cst_56 {dimension_numbers = #tpu.dot_dimension_numbers<[1], [0], [0], [1], [0, 0, 1, 1], [], []>} : vector<8x128xf32>, vector<128x128xf32>, vector<8x128xf32> -> vector<8x128xf32>
    %cst_57 = arith.constant dense<0.000000e+00> : vector<128xf32>
    %105 = vector.multi_reduction <add>, %104, %cst_57 [0] : vector<8x128xf32> to vector<128xf32>
    %106 = vector.shape_cast %105 : vector<128xf32> to vector<1x128xf32>
    %107 = arith.mulf %104, %104 : vector<8x128xf32>
    %cst_58 = arith.constant dense<0.000000e+00> : vector<128xf32>
    %108 = vector.multi_reduction <add>, %107, %cst_58 [0] : vector<8x128xf32> to vector<128xf32>
    %109 = vector.shape_cast %108 : vector<128xf32> to vector<1x128xf32>
    %cst_59 = arith.constant 5.000000e-01 : f32
    %110 = vector.broadcast %cst_59 : f32 to vector<1x128xf32>
    %111 = arith.mulf %106, %110 : vector<1x128xf32>
    %cst_60 = arith.constant 5.000000e-01 : f32
    %112 = vector.broadcast %cst_60 : f32 to vector<1x128xf32>
    %113 = arith.mulf %109, %112 : vector<1x128xf32>
    %114 = arith.mulf %111, %111 : vector<1x128xf32>
    %115 = arith.subf %113, %114 : vector<1x128xf32>
    %116 = vector.broadcast %111 : vector<1x128xf32> to vector<8x128xf32>
    %117 = arith.subf %104, %116 : vector<8x128xf32>
    %cst_61 = arith.constant 9.99999974E-6 : f32
    %118 = vector.broadcast %cst_61 : f32 to vector<1x128xf32>
    %119 = arith.addf %115, %118 : vector<1x128xf32>
    %120 = math.rsqrt %119 : vector<1x128xf32>
    %121 = vector.broadcast %120 : vector<1x128xf32> to vector<8x128xf32>
    %122 = arith.mulf %117, %121 : vector<8x128xf32>
    %123 = vector.broadcast %71 : vector<1x128xf32> to vector<8x128xf32>
    %124 = arith.mulf %122, %123 : vector<8x128xf32>
    %125 = vector.broadcast %72 : vector<1x128xf32> to vector<8x128xf32>
    %126 = arith.addf %124, %125 : vector<8x128xf32>
    %cst_62 = arith.constant 0.000000e+00 : f32
    %127 = vector.broadcast %cst_62 : f32 to vector<8x128xf32>
    %128 = arith.maximumf %126, %127 : vector<8x128xf32>
    %cst_63 = arith.constant dense<0.000000e+00> : vector<8x128xf32>
    %129 = tpu.matmul %128, %68, %cst_63 {dimension_numbers = #tpu.dot_dimension_numbers<[1], [0], [0], [1], [0, 0, 1, 1], [], []>} : vector<8x128xf32>, vector<128x128xf32>, vector<8x128xf32> -> vector<8x128xf32>
    %130 = vector.broadcast %73 : vector<1x128xf32> to vector<8x128xf32>
    %131 = arith.addf %129, %130 : vector<8x128xf32>
    %c0_64 = arith.constant 0 : index
    %c0_65 = arith.constant 0 : index
    %132 = vector.load %arg4[%c0_64, %c0_65] : memref<8x128xf32, #tpu.memory_space<vmem>>, vector<8x128xf32>
    tpu.vector_store %arg4[%c0_64, %c0_65], %131 {strides = array<i32>} : memref<8x128xf32, #tpu.memory_space<vmem>>, vector<8x128xf32>,
    return
  }
}

</mosaic_0001>

<bundles_post_ra>
// kernel: tpu_custom_call.1
= control target key start
LH: loop header
LB: loop body
LE: loop exit
PB: predicated region body
PF: predicated region fallthrough
CT: control target
= control target key end

     0   :  { %9 = vsyncpa [#allocation3], 0  ;;  %s902_s0 = inlined_call_operand.vmem [shape: f32[8,256], index: 0, kind: input, shape index: {}]   ;;  %s903_s1 = inlined_call_operand.vmem [shape: f32[32,5], index: 1, kind: input, shape index: {}]   ;;  %s904_s2 = inlined_call_operand.hbm [shape: f32[288,128], index: 2, kind: input, shape index: {}]   ;;  %s905_s3 = inlined_call_operand.vmem [shape: f32[5,128], index: 3, kind: input, shape index: {}]   ;;  %s906_s4 = inlined_call_operand.hbm [shape: f32[8,128], index: 4, kind: output, shape index: {}]  }
   0x1   :  { %10 = vsyncpa [#allocation4], 0  ;;  %s19_s17 = sshll.u32 %s904_s2, 4  ;;  %s692_s18 = smov [#allocation2]   ;;  %s20_s17 = int_to_ptr.hbm [resolvable:$true] %s19_s17 }
   0x2   :  { %s21_s19 = sshll.u32 %s692_s18, 4  ;;  %s693_s20 = smov 128   ;;  %s22_s19 = int_to_ptr.vmem [resolvable:$true] %s21_s19 }
   0x3   :  { %s694_s21 = smov 8  }
   0x4   :  { %27 = dma.hbm_to_vmem [thread:$0]  %s20_s17, 4608, %s22_s19, [#allocation3], %s693_s20, %s693_s20, %s694_s21  }
   0x5   :  { %688 = dma.done.wait [#allocation3], 4608  }
   0x6   :  { %689 = vsyncadd [#allocation3], 4294962688  ;;  %v695_v0 = vmov 1   ;;  %v696_v1 = vmov 0   ;;  %v697_v2 = vmov 2   ;;  %v34_v3 = vld [vmem:[%s903_s1] sm:$0xff] }
   0x7   :  { %614 = vset.pattern.permute.xlu1 %v695_v0  ;;  %612 = vset.pattern.permute.xlu0 %v696_v1  ;;  %v35_v4 = vld [vmem:[%s903_s1 + $0x8] sm:$0xff]  ;;  %v698_v5 = vmov 4   ;;  %v699_v6 = vmov 3   ;;  %v36_v7 = vld [vmem:[%s903_s1 + $0x10] sm:$0xff]  ;;  %v37_v8 = vld [vmem:[%s903_s1 + $0x18] sm:$0xff]  ;;  %vm353_vm0 = vcmask 7168  }
   0x8   :  { %616 = vset.pattern.permute.xlu2 %v697_v2  ;;  %99 = vperm.xlu1 %614, %v34_v3   ;;  %v38_v11 = vld [vmem:[%s902_s0] ss:$8 sm:$0x3]  ;;  %v596_v12 = vld [vmem:[%s902_s0 + $0x4] ss:$8 sm:$0x3] }
   0x9   :  { %41 = vperm.xlu0 %612, %v34_v3   ;;  %138 = vperm.xlu2 %616, %v34_v3   ;;  %v749_v14 = vperm.slane %v38_v11, 0  ;;  %v751_v15 = vperm.slane %v38_v11, 1  ;;  %v753_v16 = vperm.slane %v596_v12, 0  ;;  %v755_v17 = vperm.slane %v596_v12, 1  ;;  %s700_s26 = smov [#allocation5]   ;;  %s583_s1 = sshll.u32 %s906_s4, 4  ;;  %s584_s1 = int_to_ptr.hbm [resolvable:$true] %s583_s1 }
   0xa   :  { %v593_v19 = vld [vmem:[%s902_s0 + $0x1] ss:$8 sm:$0x3]  ;;  %v597_v20 = vld [vmem:[%s902_s0 + $0x5] ss:$8 sm:$0x3] }
   0xb   :  { %v594_v25 = vld [vmem:[%s902_s0 + $0x2] ss:$8 sm:$0x3]  ;;  %v598_v26 = vld [vmem:[%s902_s0 + $0x6] ss:$8 sm:$0x3] }
   0xc   :  { %v775_v27 = vperm.slane %v593_v19, 0  ;;  %v777_v28 = vperm.slane %v593_v19, 1  ;;  %v779_v29 = vperm.slane %v597_v20, 0  ;;  %v781_v30 = vperm.slane %v597_v20, 1  ;;  %s581_s27 = sshll.u32 %s700_s26, 4  ;;  %s582_s27 = int_to_ptr.vmem [resolvable:$true] %s581_s27 }
   0xd   :  { %v783_v37 = vperm.slane %v594_v25, 0  ;;  %v785_v38 = vperm.slane %v594_v25, 1  ;;  %v787_v39 = vperm.slane %v598_v26, 0  ;;  %v789_v40 = vperm.slane %v598_v26, 1 }
   0xe   :  { %v595_v46 = vld [vmem:[%s902_s0 + $0x3] ss:$8 sm:$0x3]  ;;  %v599_v47 = vld [vmem:[%s902_s0 + $0x7] ss:$8 sm:$0x3] }
   0xf   :  { %v803_v52 = vperm.slane %v595_v46, 0  ;;  %v805_v53 = vperm.slane %v595_v46, 1  ;;  %v807_v54 = vperm.slane %v599_v47, 0  ;;  %v809_v55 = vperm.slane %v599_v47, 1 }
  0x10   :  { %615 = vset.pattern.permute.xlu1 %v696_v1  ;;  %vm358_vm1 = vcmask 15360   ;;  %vm436_vm2 = vcmask 261120  }
  0x11   :  { %613 = vset.pattern.permute.xlu0 %v698_v5  ;;  %46 = vperm.xlu1 %615, %v35_v4  }
  0x12   :  { %73 = vperm.xlu0 %613, %v34_v3   ;;  %617 = vset.pattern.permute.xlu2 %v698_v5 }
  0x13   :  { %77 = vperm.xlu2 %617, %v35_v4  }
  0x19   :  { %618 = vset.pattern.permute.xlu1 %v695_v0 }
  0x1a   :  { %620 = vset.pattern.permute.xlu0 %v699_v6  ;;  %103 = vperm.xlu1 %618, %v35_v4  }
  0x1b   :  { %177 = vperm.xlu0 %620, %v34_v3   ;;  %619 = vset.pattern.permute.xlu2 %v696_v1 }
  0x1c   :  { %51 = vperm.xlu2 %619, %v36_v7  }
  0x22   :  { %621 = vset.pattern.permute.xlu1 %v697_v2 }
  0x23   :  { %181 = vperm.xlu0 %620, %v35_v4   ;;  %142 = vperm.xlu1 %621, %v35_v4  }
  0x24   :  { %622 = vset.pattern.permute.xlu2 %v698_v5 }
  0x25   :  { %81 = vperm.xlu2 %622, %v36_v7  }
  0x2b   :  { %627 = vset.pattern.permute.xlu0 %v695_v0  ;;  %623 = vset.pattern.permute.xlu1 %v695_v0 }
  0x2c   :  { %111 = vperm.xlu0 %627, %v37_v8   ;;  %107 = vperm.xlu1 %623, %v36_v7  }
  0x2d   :  { %624 = vset.pattern.permute.xlu2 %v696_v1 }
  0x2e   :  { %56 = vperm.xlu2 %624, %v37_v8  }
  0x34   :  { %625 = vset.pattern.permute.xlu1 %v697_v2 }
  0x35   :  { %146 = vperm.xlu1 %625, %v36_v7  }
  0x36   :  { %626 = vset.pattern.permute.xlu2 %v698_v5 }
  0x37   :  { %85 = vperm.xlu2 %626, %v37_v8  }
  0x3d   :  { %628 = vset.pattern.permute.xlu1 %v699_v6 }
  0x3e   :  { %185 = vperm.xlu1 %628, %v36_v7  }
  0x3f   :  { %629 = vset.pattern.permute.xlu2 %v697_v2 }
  0x40   :  { %150 = vperm.xlu2 %629, %v37_v8  }
  0x46   :  { %189 = vperm.xlu1 %628, %v37_v8  }
  0x63   :  { %v139_v9 = vpop.permute.xlu2 %138 }
  0x64   :  { %v158_v56 = vmul.f32 %v783_v37, %v139_v9  ;;  %v159_v57 = vmul.f32 %v785_v38, %v139_v9  ;;  %v290_v58 = vmul.f32 %v787_v39, %v139_v9  ;;  %v291_v59 = vmul.f32 %v789_v40, %v139_v9 }
  0x6d   :  { %v757_v18 = vpop.permute.xlu2 %77 }
  0x76   :  { %v795_v45 = vpop.permute.xlu2 %51 }
  0x7a   :  { %v100_v10 = vpop.permute.xlu1 %99 }
  0x7b   :  { %v42_v13 = vpop.permute.xlu0 %41  ;;  %v119_v41 = vmul.f32 %v775_v27, %v100_v10  ;;  %v120_v42 = vmul.f32 %v777_v28, %v100_v10  ;;  %v267_v43 = vmul.f32 %v779_v29, %v100_v10  ;;  %v268_v44 = vmul.f32 %v781_v30, %v100_v10 }
  0x7c   :  { %v64_v21 = vmul.f32 %v749_v14, %v42_v13  ;;  %v65_v22 = vmul.f32 %v751_v15, %v42_v13  ;;  %v244_v23 = vmul.f32 %v753_v16, %v42_v13  ;;  %v245_v24 = vmul.f32 %v755_v17, %v42_v13 }
  0x83   :  { %v47_v31 = vpop.permute.xlu1 %46 }
  0x84   :  { %v74_v32 = vpop.permute.xlu0 %73  ;;  %v66_v60 = vmul.f32 %v749_v14, %v47_v31  ;;  %v67_v61 = vmul.f32 %v751_v15, %v47_v31  ;;  %v246_v62 = vmul.f32 %v753_v16, %v47_v31  ;;  %v247_v63 = vmul.f32 %v755_v17, %v47_v31 }
  0x85   :  { %v88_v33 = vadd.f32 %v74_v32, %v64_v21  ;;  %v89_v34 = vadd.f32 %v74_v32, %v65_v22  ;;  %v252_v35 = vadd.f32 %v244_v23, %v74_v32  ;;  %v253_v36 = vadd.f32 %v245_v24, %v74_v32  ;;  %v82_v32 = vpop.permute.xlu2 %81 }
  0x86   :  { %v90_v24 = vadd.f32 %v757_v18, %v66_v60  ;;  %v91_v25 = vadd.f32 %v757_v18, %v67_v61  ;;  %v254_v26 = vadd.f32 %v246_v62, %v757_v18  ;;  %v255_v31 = vadd.f32 %v247_v63, %v757_v18 }
  0x87   :  { %v127_v48 = vadd.f32 %v119_v41, %v88_v33  ;;  %v128_v49 = vadd.f32 %v120_v42, %v89_v34  ;;  %v275_v50 = vadd.f32 %v267_v43, %v252_v35  ;;  %v276_v51 = vadd.f32 %v268_v44, %v253_v36 }
  0x89   :  { %v298_v2 = vadd.f32 %v290_v58, %v275_v50  ;;  %v299_v3 = vadd.f32 %v291_v59, %v276_v51  ;;  %v166_v4 = vadd.f32 %v158_v56, %v127_v48  ;;  %v167_v5 = vadd.f32 %v159_v57, %v128_v49 }
  0x8c   :  { %v104_v0 = vpop.permute.xlu1 %103 }
  0x8d   :  { %v178_v1 = vpop.permute.xlu0 %177  ;;  %v121_v11 = vmul.f32 %v775_v27, %v104_v0  ;;  %v122_v12 = vmul.f32 %v777_v28, %v104_v0  ;;  %v269_v13 = vmul.f32 %v779_v29, %v104_v0  ;;  %v270_v19 = vmul.f32 %v781_v30, %v104_v0 }
  0x8e   :  { %v197_v7 = vmul.f32 %v803_v52, %v178_v1  ;;  %v198_v8 = vmul.f32 %v805_v53, %v178_v1  ;;  %v313_v9 = vmul.f32 %v807_v54, %v178_v1  ;;  %v314_v10 = vmul.f32 %v809_v55, %v178_v1 }
  0x8f   :  { %v129_v41 = vadd.f32 %v121_v11, %v90_v24  ;;  %v130_v42 = vadd.f32 %v122_v12, %v91_v25  ;;  %v277_v43 = vadd.f32 %v269_v13, %v254_v26  ;;  %v278_v44 = vadd.f32 %v270_v19, %v255_v31 }
  0x90   :  { %v321_v20 = vadd.f32 %v313_v9, %v298_v2  ;;  %v322_v21 = vadd.f32 %v314_v10, %v299_v3  ;;  %v205_v22 = vadd.f32 %v197_v7, %v166_v4  ;;  %v206_v23 = vadd.f32 %v198_v8, %v167_v5  ;;  %v57_v5 = vpop.permute.xlu2 %56 }
  0x91   :  { %v70_v25 = vmul.f32 %v749_v14, %v57_v5  ;;  %v71_v26 = vmul.f32 %v751_v15, %v57_v5  ;;  %v250_v31 = vmul.f32 %v753_v16, %v57_v5 }
  0x92   :  { %v329_v33 = vmax.f32 %v321_v20, 0.0  ;;  %v330_v34 = vmax.f32 %v322_v21, 0.0  ;;  %v213_v35 = vmax.f32 %v205_v22, 0.0  ;;  %v214_v36 = vmax.f32 %v206_v23, 0.0 }
  0x93   :  { %v68_v20 = vmul.f32 %v749_v14, %v795_v45  ;;  %v69_v21 = vmul.f32 %v751_v15, %v795_v45  ;;  %v248_v22 = vmul.f32 %v753_v16, %v795_v45  ;;  %v249_v23 = vmul.f32 %v755_v17, %v795_v45 }
  0x94   :  { %v337_v46 = vadd.f32 %v330_v34, %v329_v33  ;;  %v221_v47 = vadd.f32 %v214_v36, %v213_v35  ;;  %v251_v33 = vmul.f32 %v755_v17, %v57_v5 }
  0x95   :  { %v182_v48 = vpop.permute.xlu0 %181  ;;  %v143_v49 = vpop.permute.xlu1 %142  ;;  %v256_v45 = vadd.f32 %v248_v22, %v82_v32 }
  0x96   :  { %v199_v50 = vmul.f32 %v803_v52, %v182_v48  ;;  %v200_v51 = vmul.f32 %v805_v53, %v182_v48  ;;  %v315_v56 = vmul.f32 %v807_v54, %v182_v48  ;;  %v316_v18 = vmul.f32 %v809_v55, %v182_v48  ;;  %338 = vadd.xlane.f32.xlu0 %v337_v46 }
  0x97   :  { %v160_v57 = vmul.f32 %v783_v37, %v143_v49  ;;  %v161_v58 = vmul.f32 %v785_v38, %v143_v49  ;;  %v292_v59 = vmul.f32 %v787_v39, %v143_v49  ;;  %v293_v60 = vmul.f32 %v789_v40, %v143_v49  ;;  %222 = vadd.xlane.f32.xlu2 %v221_v47 }
  0x98   :  { %v86_v19 = vpop.permute.xlu2 %85 }
  0x99   :  { %v300_v61 = vadd.f32 %v292_v59, %v277_v43  ;;  %v301_v62 = vadd.f32 %v293_v60, %v278_v44  ;;  %v168_v63 = vadd.f32 %v160_v57, %v129_v41  ;;  %v169_v0 = vadd.f32 %v161_v58, %v130_v42 }
  0x9a   :  { %v92_v42 = vadd.f32 %v82_v32, %v68_v20  ;;  %v93_v43 = vadd.f32 %v82_v32, %v69_v21  ;;  %v257_v44 = vadd.f32 %v249_v23, %v82_v32  ;;  %v94_v47 = vadd.f32 %v86_v19, %v70_v25 }
  0x9b   :  { %v323_v1 = vadd.f32 %v315_v56, %v300_v61  ;;  %v324_v2 = vadd.f32 %v316_v18, %v301_v62  ;;  %v207_v3 = vadd.f32 %v199_v50, %v168_v63  ;;  %v208_v4 = vadd.f32 %v200_v51, %v169_v0 }
  0x9c   :  { %v95_v48 = vadd.f32 %v86_v19, %v71_v26  ;;  %v258_v49 = vadd.f32 %v250_v31, %v86_v19  ;;  %v259_v50 = vadd.f32 %v251_v33, %v86_v19 }
  0x9d   :  { %v331_v7 = vmax.f32 %v323_v1, 0.0  ;;  %v332_v8 = vmax.f32 %v324_v2, 0.0  ;;  %v215_v9 = vmax.f32 %v207_v3, 0.0  ;;  %v216_v10 = vmax.f32 %v208_v4, 0.0 }
  0x9e   :  { %v108_v11 = vpop.permute.xlu1 %107  ;;  %v112_v46 = vpop.permute.xlu0 %111 }
  0x9f   :  { %v340_v12 = vadd.f32 %v332_v8, %v331_v7  ;;  %v224_v13 = vadd.f32 %v216_v10, %v215_v9  ;;  %v123_v34 = vmul.f32 %v775_v27, %v108_v11  ;;  %v124_v35 = vmul.f32 %v777_v28, %v108_v11 }
  0xa0   :  { %v271_v36 = vmul.f32 %v779_v29, %v108_v11  ;;  %v272_v41 = vmul.f32 %v781_v30, %v108_v11  ;;  %v125_v58 = vmul.f32 %v775_v27, %v112_v46  ;;  %v126_v32 = vmul.f32 %v777_v28, %v112_v46  ;;  %v151_v61 = vpop.permute.xlu2 %150 }
  0xa1   :  { %341 = vadd.xlane.f32.xlu2 %v340_v12  ;;  %225 = vadd.xlane.f32.xlu1 %v224_v13  ;;  %v131_v51 = vadd.f32 %v123_v34, %v92_v42  ;;  %v132_v56 = vadd.f32 %v124_v35, %v93_v43  ;;  %v273_v59 = vmul.f32 %v779_v29, %v112_v46 }
  0xa2   :  { %v279_v18 = vadd.f32 %v271_v36, %v256_v45  ;;  %v280_v57 = vadd.f32 %v272_v41, %v257_v44  ;;  %v274_v60 = vmul.f32 %v781_v30, %v112_v46  ;;  %v164_v28 = vmul.f32 %v783_v37, %v151_v61 }
  0xa3   :  { %v165_v29 = vmul.f32 %v785_v38, %v151_v61  ;;  %v296_v30 = vmul.f32 %v787_v39, %v151_v61  ;;  %v297_v7 = vmul.f32 %v789_v40, %v151_v61  ;;  %v133_v12 = vadd.f32 %v125_v58, %v94_v47  ;;  %v366_v58 = vld [vmem:[#allocation2 + $0x18] sm:$0xff] }
  0xa4   :  { %v134_v13 = vadd.f32 %v126_v32, %v95_v48  ;;  %v281_v19 = vadd.f32 %v273_v59, %v258_v49  ;;  %v282_v20 = vadd.f32 %v274_v60, %v259_v50  ;;  %v365_v32 = vld [vmem:[#allocation2 + $0x10] sm:$0xff]  ;;  %452 = vmatpush.msra.mxu0 %v366_v58  ;;  %v364_v59 = vld [vmem:[#allocation2 + $0x8] sm:$0xff]  ;;  %v363_v60 = vld [vmem:[#allocation2] sm:$0xff] }
  0xa6   :  { %v305_v31 = vadd.f32 %v297_v7, %v282_v20  ;;  %v173_v33 = vadd.f32 %v165_v29, %v134_v13  ;;  %453 = vmatpush.msra.mxu0 %v365_v32  ;;  %v382_v7 = vld [vmem:[#allocation2 + $0x98] sm:$0xff]  ;;  %v376_v13 = vld [vmem:[#allocation2 + $0x68] sm:$0xff] }
  0xa7   :  { %v147_v24 = vpop.permute.xlu1 %146  ;;  %499 = vmatpush.msra.mxu1 %v382_v7  ;;  %v374_v20 = vld [vmem:[#allocation2 + $0x58] sm:$0xff] }
  0xa8   :  { %v162_v14 = vmul.f32 %v783_v37, %v147_v24  ;;  %v163_v15 = vmul.f32 %v785_v38, %v147_v24  ;;  %v294_v16 = vmul.f32 %v787_v39, %v147_v24  ;;  %v295_v17 = vmul.f32 %v789_v40, %v147_v24  ;;  %454 = vmatpush.msra.mxu0 %v364_v59 }
  0xa9   :  { %v304_v38 = vadd.f32 %v296_v30, %v281_v19  ;;  %v172_v39 = vadd.f32 %v164_v28, %v133_v12  ;;  %v377_v12 = vld [vmem:[#allocation2 + $0x70] sm:$0xff]  ;;  %v375_v19 = vld [vmem:[#allocation2 + $0x60] sm:$0xff] }
  0xaa   :  { %v302_v63 = vadd.f32 %v294_v16, %v279_v18  ;;  %v303_v0 = vadd.f32 %v295_v17, %v280_v57  ;;  %v170_v1 = vadd.f32 %v162_v14, %v131_v51  ;;  %v171_v2 = vadd.f32 %v163_v15, %v132_v56  ;;  %455 = vmatpush.msra.mxu0 %v363_v60 }
  0xb0   :  { %v186_v62 = vpop.permute.xlu1 %185 }
  0xb1   :  { %v201_v3 = vmul.f32 %v803_v52, %v186_v62  ;;  %v202_v4 = vmul.f32 %v805_v53, %v186_v62  ;;  %v317_v5 = vmul.f32 %v807_v54, %v186_v62  ;;  %v318_v27 = vmul.f32 %v809_v55, %v186_v62 }
  0xb3   :  { %v325_v8 = vadd.f32 %v317_v5, %v302_v63  ;;  %v326_v9 = vadd.f32 %v318_v27, %v303_v0  ;;  %v209_v10 = vadd.f32 %v201_v3, %v170_v1  ;;  %v210_v11 = vadd.f32 %v202_v4, %v171_v2 }
  0xb5   :  { %v333_v21 = vmax.f32 %v325_v8, 0.0  ;;  %v334_v22 = vmax.f32 %v326_v9, 0.0  ;;  %v217_v23 = vmax.f32 %v209_v10, 0.0  ;;  %v218_v24 = vmax.f32 %v210_v11, 0.0  ;;  %v381_v8 = vld [vmem:[#allocation2 + $0x90] sm:$0xff]  ;;  %v380_v9 = vld [vmem:[#allocation2 + $0x88] sm:$0xff] }
  0xb6   :  { %500 = vmatpush.msra.mxu1 %v381_v8  ;;  %v379_v10 = vld [vmem:[#allocation2 + $0x80] sm:$0xff]  ;;  %v378_v11 = vld [vmem:[#allocation2 + $0x78] sm:$0xff] }
  0xb7   :  { %v343_v25 = vadd.f32 %v334_v22, %v333_v21  ;;  %v227_v37 = vadd.f32 %v218_v24, %v217_v23  ;;  %v373_v23 = vld [vmem:[#allocation2 + $0x50] sm:$0xff] }
  0xb8   :  { %v190_v26 = vpop.permute.xlu1 %189  ;;  %501 = vmatpush.msra.mxu1 %v380_v9  ;;  %v388_v9 = vld [vmem:[#allocation2 + $0xc8] sm:$0xff] }
  0xb9   :  { %v203_v40 = vmul.f32 %v803_v52, %v190_v26  ;;  %v204_v34 = vmul.f32 %v805_v53, %v190_v26  ;;  %v319_v35 = vmul.f32 %v807_v54, %v190_v26  ;;  %v320_v36 = vmul.f32 %v809_v55, %v190_v26  ;;  %344 = vadd.xlane.f32.xlu0 %v343_v25 }
  0xba   :  { %228 = vadd.xlane.f32.xlu2 %v227_v37  ;;  %502 = vmatpush.msra.mxu1 %v379_v10  ;;  %v372_v37 = vld [vmem:[#allocation2 + $0x48] sm:$0xff] }
  0xbb   :  { %v327_v41 = vadd.f32 %v319_v35, %v304_v38  ;;  %v328_v42 = vadd.f32 %v320_v36, %v305_v31  ;;  %v211_v43 = vadd.f32 %v203_v40, %v172_v39  ;;  %v212_v45 = vadd.f32 %v204_v34, %v173_v33  ;;  %v371_v31 = vld [vmem:[#allocation2 + $0x40] sm:$0xff]  ;;  %v370_v40 = vld [vmem:[#allocation2 + $0x38] sm:$0xff]  ;;  %v369_v34 = vld [vmem:[#allocation2 + $0x30] sm:$0xff] }
  0xbc   :  { %503 = vmatpush.msra.mxu1 %v378_v11 }
  0xbd   :  { %v335_v44 = vmax.f32 %v327_v41, 0.0  ;;  %v336_v46 = vmax.f32 %v328_v42, 0.0  ;;  %v219_v14 = vmax.f32 %v211_v43, 0.0  ;;  %v220_v15 = vmax.f32 %v212_v45, 0.0  ;;  %v368_v41 = vld [vmem:[#allocation2 + $0x28] sm:$0xff]  ;;  %v367_v45 = vld [vmem:[#allocation2 + $0x20] sm:$0xff] }
  0xbe   :  { %504 = vmatpush.msra.mxu1 %v377_v12  ;;  %v387_v12 = vld [vmem:[#allocation2 + $0xc0] sm:$0xff] }
  0xbf   :  { %v346_v16 = vadd.f32 %v336_v46, %v335_v44  ;;  %v230_v17 = vadd.f32 %v220_v15, %v219_v14 }
  0xc0   :  { %505 = vmatpush.msra.mxu1 %v376_v13 }
  0xc1   :  { %231 = vadd.xlane.f32.xlu1 %v230_v17 }
  0xc2   :  { %347 = vadd.xlane.f32.xlu2 %v346_v16  ;;  %506 = vmatpush.msra.mxu1 %v375_v19 }
  0xc4   :  { %507 = vmatpush.msra.mxu1 %v374_v20  ;;  %v385_v20 = vld [vmem:[#allocation2 + $0xb0] sm:$0xff] }
  0xc6   :  { %508 = vmatpush.msra.mxu1 %v373_v23  ;;  %v384_v23 = vld [vmem:[#allocation2 + $0xa8] sm:$0xff] }
  0xc8   :  { %509 = vmatpush.msra.mxu1 %v372_v37  ;;  %v383_v37 = vld [vmem:[#allocation2 + $0xa0] sm:$0xff] }
  0xca   :  { %510 = vmatpush.msra.mxu1 %v371_v31 }
  0xcc   :  { %511 = vmatpush.msra.mxu1 %v370_v40 }
  0xce   :  { %512 = vmatpush.msra.mxu1 %v369_v34 }
  0xd0   :  { %513 = vmatpush.msra.mxu1 %v368_v41 }
  0xd2   :  { %514 = vmatpush.msra.mxu1 %v367_v45 }
 0x109   :  { %v339_v52 = vpop.xlane.xlu0 %338 }
 0x10a   :  { %v223_v53 = vpop.xlane.xlu2 %222  ;;  %v349_v47 = vmul.f32 0.00390625, %v339_v52 }
 0x10b   :  { %v233_v54 = vmul.f32 0.00390625, %v223_v53 }
 0x10d   :  { %v354_v55 = vsel %vm353_vm0, %v233_v54, %v349_v47 }
 0x10e   :  { %v359_v48 = vsel %vm358_vm1, %v354_v55, 0.0 }
 0x10f   :  { %404 = vxpose.xlu0.b32.start [1/4] (short) (narrow) %v359_v48, 8 }
 0x114   :  { %v342_v49 = vpop.xlane.xlu2 %341  ;;  %v226_v50 = vpop.xlane.xlu1 %225 }
 0x115   :  { %v350_v51 = vmul.f32 0.00390625, %v342_v49  ;;  %v234_v56 = vmul.f32 0.00390625, %v226_v50  ;;  %v495_v49 = vlaneseq }
 0x117   :  { %v355_v18 = vsel %vm353_vm0, %v234_v56, %v350_v51  ;;  %v631_v51 = vld [vmem:[%s905_s3] ss:$0 sm:$0xff]  ;;  %v496_v58 = vshrl.u32 %v495_v49, 7 }
 0x118   :  { %v360_v57 = vsel %vm358_vm1, %v355_v18, 0.0 }
 0x119   :  { %405 = vxpose.xlu0.b32.cont [2/4] (short) (narrow) %v360_v57, 8  ;;  %v632_v57 = vld [vmem:[%s905_s3 + $0x1] ss:$0 sm:$0xff]  ;;  %vm497_vm6 = vcmp.lt.s32.totalorder %v496_v58, 2 }
 0x12c   :  { %v345_v61 = vpop.xlane.xlu0 %344 }
 0x12d   :  { %v229_v62 = vpop.xlane.xlu2 %228  ;;  %v351_v63 = vmul.f32 0.00390625, %v345_v61  ;;  %v398_v61 = vld [vmem:[#allocation2 + $0x118] sm:$0xff] }
 0x12e   :  { %v235_v0 = vmul.f32 0.00390625, %v229_v62  ;;  %555 = vmatpush.msra.mxu2 %v398_v61  ;;  %v397_v62 = vld [vmem:[#allocation2 + $0x110] sm:$0xff] }
 0x130   :  { %v356_v1 = vsel %vm353_vm0, %v235_v0, %v351_v63  ;;  %556 = vmatpush.msra.mxu2 %v397_v62  ;;  %v396_v63 = vld [vmem:[#allocation2 + $0x108] sm:$0xff]  ;;  %v395_v0 = vld [vmem:[#allocation2 + $0x100] sm:$0xff] }
 0x131   :  { %v361_v2 = vsel %vm358_vm1, %v356_v1, 0.0  ;;  %v394_v1 = vld [vmem:[#allocation2 + $0xf8] sm:$0xff] }
 0x132   :  { %406 = vxpose.xlu0.b32.cont [3/4] (short) (narrow) %v361_v2, 8  ;;  %557 = vmatpush.msra.mxu2 %v396_v63  ;;  %v393_v2 = vld [vmem:[#allocation2 + $0xf0] sm:$0xff] }
 0x134   :  { %v232_v3 = vpop.xlane.xlu1 %231  ;;  %558 = vmatpush.msra.mxu2 %v395_v0 }
 0x135   :  { %v348_v4 = vpop.xlane.xlu2 %347  ;;  %v236_v5 = vmul.f32 0.00390625, %v232_v3  ;;  %v392_v3 = vld [vmem:[#allocation2 + $0xe8] sm:$0xff] }
 0x136   :  { %v352_v27 = vmul.f32 0.00390625, %v348_v4  ;;  %559 = vmatpush.msra.mxu2 %v394_v1  ;;  %v391_v4 = vld [vmem:[#allocation2 + $0xe0] sm:$0xff] }
 0x138   :  { %v357_v28 = vsel %vm353_vm0, %v236_v5, %v352_v27  ;;  %560 = vmatpush.msra.mxu2 %v393_v2  ;;  %v390_v27 = vld [vmem:[#allocation2 + $0xd8] sm:$0xff] }
 0x139   :  { %v362_v29 = vsel %vm358_vm1, %v357_v28, 0.0 }
 0x13a   :  { %407 = vxpose.xlu0.b32.end [4/4] (short) (narrow) %v362_v29, 8  ;;  %561 = vmatpush.msra.mxu2 %v392_v3 }
 0x13c   :  { %562 = vmatpush.msra.mxu2 %v391_v4 }
 0x13e   :  { %563 = vmatpush.msra.mxu2 %v390_v27 }
 0x1a1   :  { %630 = vset.pattern.permute.xlu0 %v699_v6 }
 0x1c6   :  { %v420_v30 = vpop.trf.xlu0 }
 0x1c7   :  { %600 = vmatmul.msk.f32.vlgmr.msra.gmra.mxu0 %vm436_vm2, %v420_v30  ;;  %v389_v30 = vld [vmem:[#allocation2 + $0xd0] sm:$0xff] }
 0x1c8   :  { %564 = vmatpush.msra.mxu2 %v389_v30 }
 0x1ca   :  { %565 = vmatpush.msra.mxu2 %v388_v9 }
 0x1cc   :  { %566 = vmatpush.msra.mxu2 %v387_v12 }
 0x244   :  { %v457_v6 = vpop.f32.mrf.mxu0 }
 0x245   :  { %v460_v21 = vrot.slane %v457_v6, 4  ;;  %v466_v22 = vmul.f32 %v457_v6, %v457_v6 }
 0x247   :  { %v461_v24 = vadd.f32 %v460_v21, %v457_v6  ;;  %v467_v25 = vrot.slane %v466_v22, 4 }
 0x249   :  { %v462_v26 = vrot.slane %v461_v24, 2  ;;  %v468_v38 = vadd.f32 %v467_v25, %v466_v22 }
 0x24b   :  { %v463_v39 = vadd.f32 %v462_v26, %v461_v24  ;;  %v469_v33 = vrot.slane %v468_v38, 2 }
 0x24d   :  { %v464_v35 = vrot.slane %v463_v39, 1  ;;  %v470_v36 = vadd.f32 %v469_v33, %v468_v38 }
 0x24f   :  { %v465_v42 = vadd.f32 %v464_v35, %v463_v39  ;;  %v471_v43 = vrot.slane %v470_v36, 1 }
 0x251   :  { %v472_v44 = vadd.f32 %v471_v43, %v470_v36  ;;  %v473_v46 = vmul.f32 0.5, %v465_v42 }
 0x253   :  { %v474_v14 = vmul.f32 0.5, %v472_v44  ;;  %v475_v15 = vmul.f32 %v473_v46, %v473_v46  ;;  %v477_v50 = vsub.f32 %v457_v6, %v473_v46  ;;  %v386_v6 = vld [vmem:[#allocation2 + $0xb8] sm:$0xff]  ;;  %v633_v44 = vld [vmem:[%s905_s3 + $0x2] ss:$0 sm:$0xff] }
 0x254   :  { %567 = vmatpush.msra.mxu2 %v386_v6 }
 0x255   :  { %v476_v16 = vsub.f32 %v474_v14, %v475_v15  ;;  %v634_v15 = vld [vmem:[%s905_s3 + $0x3] ss:$0 sm:$0xff] }
 0x256   :  { %568 = vmatpush.msra.mxu2 %v385_v20 }
 0x257   :  { %v478_v17 = vadd.f32 1e-05, %v476_v16 }
 0x258   :  { %569 = vmatpush.msra.mxu2 %v384_v23 }
 0x259   :  { %636 = vrsqrt.f32 %v478_v17  ;;  %vm485_vm4 = vweird.f32 %v478_v17 }
 0x25a   :  { %570 = vmatpush.msra.mxu2 %v383_v37 }
 0x25f   :  { %v637_v52 = vpop.eup %636 }
 0x260   :  { %v480_v53 = vmul.f32 %v637_v52, %v478_v17  ;;  %vm486_vm3 = vweird.f32 %v637_v52 }
 0x261   :  { %vm487_vm5 = vmor %vm485_vm4, %vm486_vm3 }
 0x262   :  { %v481_v47 = vmul.f32 %v637_v52, %v480_v53  ;;  %v635_v53 = vld [vmem:[%s905_s3 + $0x4] ss:$0 sm:$0xff] }
 0x264   :  { %v482_v54 = vmul.f32 0.5, %v481_v47 }
 0x266   :  { %v483_v55 = vsub.f32 1.5, %v482_v54 }
 0x268   :  { %v484_v48 = vmul.f32 %v637_v52, %v483_v55 }
 0x26a   :  { %v488_v56 = vsel %vm487_vm5, %v637_v52, %v484_v48 }
 0x26b   :  { %v489_v18 = vmul.f32 %v488_v56, %v477_v50 }
 0x26d   :  { %v491_v32 = vmul.f32 %v631_v51, %v489_v18 }
 0x26f   :  { %v493_v59 = vadd.f32 %v632_v57, %v491_v32 }
 0x271   :  { %v494_v60 = vmax.f32 %v493_v59, 0.0 }
 0x273   :  { %601 = vmatmul.msk.f32.vlgmr.msra.gmra.mxu1 %vm497_vm6, %v494_v60 }
 0x2f0   :  { %v516_v5 = vpop.f32.mrf.mxu1 }
 0x2f1   :  { %v519_v28 = vrot.slane %v516_v5, 4  ;;  %v525_v29 = vmul.f32 %v516_v5, %v516_v5 }
 0x2f3   :  { %v520_v7 = vadd.f32 %v519_v28, %v516_v5  ;;  %v526_v8 = vrot.slane %v525_v29, 4 }
 0x2f5   :  { %v521_v10 = vrot.slane %v520_v7, 2  ;;  %v527_v11 = vadd.f32 %v526_v8, %v525_v29 }
 0x2f7   :  { %v522_v13 = vadd.f32 %v521_v10, %v520_v7  ;;  %v528_v19 = vrot.slane %v527_v11, 2 }
 0x2f9   :  { %v523_v21 = vrot.slane %v522_v13, 1  ;;  %v529_v22 = vadd.f32 %v528_v19, %v527_v11 }
 0x2fb   :  { %v524_v24 = vadd.f32 %v523_v21, %v522_v13  ;;  %v530_v25 = vrot.slane %v529_v22, 1 }
 0x2fd   :  { %v531_v26 = vadd.f32 %v530_v25, %v529_v22  ;;  %v532_v38 = vmul.f32 0.5, %v524_v24 }
 0x2ff   :  { %v533_v31 = vmul.f32 0.5, %v531_v26  ;;  %v534_v39 = vmul.f32 %v532_v38, %v532_v38  ;;  %v536_v45 = vsub.f32 %v516_v5, %v532_v38 }
 0x301   :  { %v535_v33 = vsub.f32 %v533_v31, %v534_v39 }
 0x303   :  { %v537_v40 = vadd.f32 1e-05, %v535_v33 }
 0x305   :  { %638 = vrsqrt.f32 %v537_v40  ;;  %vm544_vm8 = vweird.f32 %v537_v40 }
 0x30b   :  { %v639_v34 = vpop.eup %638 }
 0x30c   :  { %v539_v35 = vmul.f32 %v639_v34, %v537_v40  ;;  %vm545_vm7 = vweird.f32 %v639_v34 }
 0x30d   :  { %vm546_vm9 = vmor %vm544_vm8, %vm545_vm7 }
 0x30e   :  { %v540_v36 = vmul.f32 %v639_v34, %v539_v35 }
 0x310   :  { %v541_v41 = vmul.f32 0.5, %v540_v36 }
 0x312   :  { %v542_v42 = vsub.f32 1.5, %v541_v41 }
 0x314   :  { %v543_v43 = vmul.f32 %v639_v34, %v542_v42 }
 0x316   :  { %v547_v46 = vsel %vm546_vm9, %v639_v34, %v543_v43 }
 0x317   :  { %v548_v14 = vmul.f32 %v547_v46, %v536_v45 }
 0x319   :  { %v550_v16 = vmul.f32 %v633_v44, %v548_v14 }
 0x31b   :  { %v552_v17 = vadd.f32 %v634_v15, %v550_v16 }
 0x31d   :  { %v553_v52 = vmax.f32 %v552_v17, 0.0 }
 0x31f   :  { %571 = vmatmul.f32.vlgmr.msra.gmra.mxu2 %v553_v52 }
 0x3a2   :  { %v572_v47 = vpop.f32.mrf.mxu2 }
 0x3a3   :  { %v573_v54 = vadd.f32 %v635_v53, %v572_v47 }
 0x3a5   :  { %575 = vst [vmem:[#allocation5] sm:$0xff] %v573_v54 }
 0x3a6   :  { %586 = dma.vmem_to_hbm [thread:$0]  %s582_s27, 128, %s584_s1, [#allocation4]  }
 0x3a7   :  { %690 = dma.done.wait [#allocation4], 128  }
 0x3a8   :  { %691 = vsyncadd [#allocation4], 4294967168 }
 0x3a9   :  { %591 = vsyncpa [#allocation3], 1 }
 0x3aa   :  { %592 = vsyncpa [#allocation4], 1 }

</bundles_post_ra>
